<compile_context>
chip_gen: v5e
topology: v5e:2x2
jax: 0.10.0
libtpu: 0.0.40
codegen_flags: <defaults>
</compile_context>

<pallas_src>
import jax
import jax.numpy as jnp
from jax.experimental import pallas as pl
from jax.experimental.pallas import tpu as pltpu


def _round_up(x: int, m: int) -> int:
    return ((x + m - 1) // m) * m


def _make_indices_to_names_kernel(padding_idx: int, vocab_size: int):
    def kernel(table_ref, idx_ref, codes_ref):
        idx = idx_ref[...]                                   # (TB, Lp) int32
        # Valid = not padding and in-range; out-of-range indices become -1.
        valid = (idx != jnp.int32(padding_idx)) & (idx >= 0) & (idx < vocab_size)
        safe_idx = jnp.clip(idx, 0, vocab_size - 1)

        # Direct lane gather from the resident lane-dense table row.
        table_row = table_ref[...]                           # (1, Vp) int32
        table_b = jnp.broadcast_to(
            table_row, (idx.shape[0], table_row.shape[1]))   # (TB, Vp)
        gathered = jnp.take_along_axis(
            table_b, safe_idx, axis=-1, mode="promise_in_bounds")  # (TB, Lp)

        codes_ref[...] = jnp.where(valid, gathered, jnp.int32(-1))

    return kernel


def indices_to_name_codes(indices: jax.Array, name_code_table: jax.Array,
                          padding_idx: int, *, row_tile: int = 512) -> jax.Array:
    """indices: (B, L) int32, name_code_table: (V,) int32 -> (B, L) int32 codes.

    codes[b, l] = name_code_table[indices[b, l]] when the index is valid
    (not padding_idx and in [0, V)), else -1.
    """
    B, L = indices.shape
    V = int(name_code_table.shape[0])

    # Lane-dense, 128-padded vocab row so the whole table stays in VMEM.
    Vp = _round_up(max(V, 1), 128)
    table2d = jnp.full((1, Vp), -1, dtype=jnp.int32)
    table2d = table2d.at[0, :V].set(name_code_table.astype(jnp.int32))

    # Pad (B, L) to TPU-friendly tiles; padded slots carry padding_idx so they
    # fall out as invalid (-1) and are sliced away afterwards.
    Lp = _round_up(L, 128)
    TB = min(_round_up(row_tile, 8), _round_up(B, 8))        # rows per grid step
    Bp = _round_up(B, TB)
    idx_p = jnp.full((Bp, Lp), jnp.int32(padding_idx))
    idx_p = idx_p.at[:B, :L].set(indices.astype(jnp.int32))

    kernel = _make_indices_to_names_kernel(padding_idx, V)
    codes_p = pl.pallas_call(
        kernel,
        out_shape=jax.ShapeDtypeStruct((Bp, Lp), jnp.int32),
        grid=(Bp // TB,),
        in_specs=[
            # Table: same block every step -> DMA'd once, resident in VMEM.
            pl.BlockSpec((1, Vp), lambda i: (0, 0),
                         memory_space=pltpu.MemorySpace.VMEM),
            pl.BlockSpec((TB, Lp), lambda i: (i, 0),
                         memory_space=pltpu.MemorySpace.VMEM),
        ],
        out_specs=pl.BlockSpec((TB, Lp), lambda i: (i, 0),
                               memory_space=pltpu.MemorySpace.VMEM),
        compiler_params=pltpu.CompilerParams(
            dimension_semantics=("parallel",)),
    )(table2d, idx_p)
    return codes_p[:B, :L]


class IndicesToNames:
    """JAX/Pallas re-implementation of torchoutil's IndicesToNames."""

    def __init__(self, idx_to_name, *, padding_idx=None):
        self.idx_to_name = dict(idx_to_name)
        self.padding_idx = padding_idx
        V = max(self.idx_to_name.keys()) + 1
        # Deterministic synthetic "name codes": code (1000 + v) <-> idx_to_name[v].
        self._code_table = jnp.arange(V, dtype=jnp.int32) + 1000
        self._code_to_name = {1000 + v: n for v, n in self.idx_to_name.items()}
        # Sentinel used inside the kernel when padding_idx is None (an index
        # that can never legitimately appear), so the kernel always has a scalar.
        self._kernel_pad = padding_idx if padding_idx is not None else -(10 ** 6)

    def __call__(self, indices: jax.Array):
        codes = indices_to_name_codes(indices, self._code_table, self._kernel_pad)
        # Mask derived outside the kernel (saves a second full-tile store).
        mask = (codes != -1).astype(jnp.int32)
        codes = jax.block_until_ready(codes)
        # TODO(synk): mapping int codes to arbitrary Python objects has no
        # Pallas equivalent; this host loop dominates wall time at small sizes
        # and should be deferred/batched in serving paths.
        names = []
        for row in codes.tolist():
            names.append([self._code_to_name[c] for c in row if c != -1])
        return names, codes, mask


if __name__ == "__main__":
    B, L, V = 8, 128, 128
    PADDING_IDX = 0

    key = jax.random.PRNGKey(0)
    k_idx, k_pad = jax.random.split(key)
    indices = jax.random.randint(k_idx, (B, L), 0, V, dtype=jnp.int32)
    # Randomly sprinkle padding entries.
    pad_mask = jax.random.bernoulli(k_pad, 0.3, (B, L))
    indices = jnp.where(pad_mask, jnp.int32(PADDING_IDX), indices)

    idx_to_name = {v: f"name_{v}" for v in range(V)}
    module = IndicesToNames(idx_to_name, padding_idx=PADDING_IDX)

    names, codes, mask = module(indices)
    codes = jax.block_until_ready(codes)
    mask = jax.block_until_ready(mask)

    # Host-side reference check of kernel semantics.
    ref_codes = jnp.where(indices != PADDING_IDX, indices + 1000, jnp.int32(-1))
    ref_mask = (indices != PADDING_IDX).astype(jnp.int32)
    assert jnp.array_equal(codes, ref_codes), "name-code gather mismatch"
    assert jnp.array_equal(mask, ref_mask), "padding mask mismatch"
    ref_names = [
        [idx_to_name[i] for i in row if i != PADDING_IDX]
        for row in indices.tolist()
    ]
    assert names == ref_names, "name list mismatch"

    print("KERNEL_OK")
</pallas_src>

<mosaic_0001>
module attributes {stable_mosaic.version = 11 : i64} {
  func.func @kernel(%arg0: i32, %arg1: memref<1x128xi32, #tpu.memory_space<vmem>>, %arg2: memref<8x128xi32, #tpu.memory_space<vmem>>, %arg3: memref<8x128xi32, #tpu.memory_space<vmem>>) attributes {dimension_semantics = [#tpu.dimension_semantics<parallel>], iteration_bounds = array<i64: 1>, scalar_prefetch = 0 : i64, scratch_operands = 0 : i64, tpu.core_type = #tpu.core_type<tc>, window_params = [{pipeline_mode = #tpu.pipeline_mode<synchronous>, transform_indices = @transform_0, window_bounds = array<i64: 1, 128>}, {transform_indices = @transform_1, window_bounds = array<i64: 8, 128>}, {transform_indices = @transform_2, window_bounds = array<i64: 8, 128>}]} {
    %c0 = arith.constant 0 : index
    %c0_0 = arith.constant 0 : index
    %0 = vector.load %arg2[%c0, %c0_0] : memref<8x128xi32, #tpu.memory_space<vmem>>, vector<8x128xi32>
    %c0_i32 = arith.constant 0 : i32
    %1 = vector.broadcast %c0_i32 : i32 to vector<8x128xi32>
    %2 = arith.cmpi ne, %0, %1 : vector<8x128xi32>
    %c0_i32_1 = arith.constant 0 : i32
    %3 = vector.broadcast %c0_i32_1 : i32 to vector<8x128xi32>
    %4 = arith.cmpi sge, %0, %3 : vector<8x128xi32>
    %5 = arith.andi %2, %4 : vector<8x128xi1>
    %c128_i32 = arith.constant 128 : i32
    %6 = vector.broadcast %c128_i32 : i32 to vector<8x128xi32>
    %7 = arith.cmpi slt, %0, %6 : vector<8x128xi32>
    %8 = arith.andi %5, %7 : vector<8x128xi1>
    %c0_i32_2 = arith.constant 0 : i32
    %c127_i32 = arith.constant 127 : i32
    %9 = vector.broadcast %c0_i32_2 : i32 to vector<8x128xi32>
    %10 = arith.maxsi %9, %0 : vector<8x128xi32>
    %11 = vector.broadcast %c127_i32 : i32 to vector<8x128xi32>
    %12 = arith.minsi %11, %10 : vector<8x128xi32>
    %c0_3 = arith.constant 0 : index
    %c0_4 = arith.constant 0 : index
    %13 = vector.load %arg1[%c0_3, %c0_4] : memref<1x128xi32, #tpu.memory_space<vmem>>, vector<1x128xi32>
    %14 = vector.shape_cast %13 : vector<1x128xi32> to vector<1x128xi32>
    %15 = vector.broadcast %14 : vector<1x128xi32> to vector<8x128xi32>
    %16 = vector.shape_cast %12 : vector<8x128xi32> to vector<8x128x1xi32>
    %17 = vector.shape_cast %16 : vector<8x128x1xi32> to vector<8x128xi32>
    %18 = tpu.dynamic_gather %15[%17] in [1] : vector<8x128xi32>, vector<8x128xi32> -> vector<8x128xi32>
    %c-1_i32 = arith.constant -1 : i32
    %19 = vector.broadcast %c-1_i32 : i32 to vector<8x128xi32>
    %20 = arith.select %8, %18, %19 : vector<8x128xi1>, vector<8x128xi32>
    %c0_5 = arith.constant 0 : index
    %c0_6 = arith.constant 0 : index
    %21 = vector.load %arg3[%c0_5, %c0_6] : memref<8x128xi32, #tpu.memory_space<vmem>>, vector<8x128xi32>
    tpu.vector_store %arg3[%c0_5, %c0_6], %20 {strides = array<i32>} : memref<8x128xi32, #tpu.memory_space<vmem>>, vector<8x128xi32>,
    return
  }
  func.func @transform_0(%arg0: i32) -> (i32, i32) {
    %c0_i32 = arith.constant 0 : i32
    %c0_i32_0 = arith.constant 0 : i32
    %c0_i32_1 = arith.constant 0 : i32
    return %c0_i32, %c0_i32_0 : i32, i32
  }
  func.func @transform_1(%arg0: i32) -> (i32, i32) {
    %c0_i32 = arith.constant 0 : i32
    %c0_i32_0 = arith.constant 0 : i32
    return %arg0, %c0_i32 : i32, i32
  }
  func.func @transform_2(%arg0: i32) -> (i32, i32) {
    %c0_i32 = arith.constant 0 : i32
    %c0_i32_0 = arith.constant 0 : i32
    return %arg0, %c0_i32 : i32, i32
  }
}

</mosaic_0001>

<bundles_post_ra>
// kernel: tpu_custom_call.1
= control target key start
LH: loop header
LB: loop body
LE: loop exit
PB: predicated region body
PF: predicated region fallthrough
CT: control target
= control target key end

     0   :  { %7 = vsyncpa [#allocation3], 0  ;;  %s185_s0 = inlined_call_operand.hbm [shape: s32[1,128], index: 0, kind: input, shape index: {}]   ;;  %s186_s1 = inlined_call_operand.hbm [shape: s32[8,128], index: 1, kind: input, shape index: {}]   ;;  %s187_s2 = inlined_call_operand.hbm [shape: s32[8,128], index: 2, kind: output, shape index: {}]  }
   0x1   :  { %8 = vsyncpa [#allocation6], 0 }
   0x2   :  { %9 = vsyncpa [#allocation4], 0  ;;  %s15_s11 = sshll.u32 %s185_s0, 4  ;;  %s158_s12 = smov [#allocation2]   ;;  %s16_s11 = int_to_ptr.hbm [resolvable:$true] %s15_s11 }
   0x3   :  { %s17_s13 = sshll.u32 %s158_s12, 4  ;;  %s26_s16 = sshll.u32 %s186_s1, 4  ;;  %s18_s13 = int_to_ptr.vmem [resolvable:$true] %s17_s13  ;;  %s27_s16 = int_to_ptr.hbm [resolvable:$true] %s26_s16 }
   0x4   :  { %20 = dma.hbm_to_vmem [thread:$0]  %s16_s11, 16, %s18_s13, [#allocation3]  }
   0x5   :  { %s159_s17 = smov [#allocation5]  }
   0x6   :  { %s28_s18 = sshll.u32 %s159_s17, 4  ;;  %s29_s18 = int_to_ptr.vmem [resolvable:$true] %s28_s18 }
   0x7   :  { %31 = dma.hbm_to_vmem [thread:$0]  %s27_s16, 128, %s29_s18, [#allocation6]  }
   0x8   :  { %152 = dma.done.wait [#allocation3], 16  }
   0x9   :  { %153 = vsyncadd [#allocation3], 4294967280 }
   0xa   :  { %154 = dma.done.wait [#allocation6], 128  }
   0xb   :  { %155 = vsyncadd [#allocation6], 4294967168  ;;  %v40_v0 = vld [vmem:[#allocation5] sm:$0xff]  ;;  %v79_v3 = vld [vmem:[#allocation2] ss:$0 sm:$0xff]  ;;  %s160_s0 = smov [#allocation7]  }
   0xc   :  { %vm46_vm0 = vcmp.gt.s32.totalorder %v40_v0, 0  ;;  %vm41_vm2 = vcmp.ne.s32.totalorder %v40_v0, 0  ;;  %vm42_vm3 = vcmp.ge.s32.totalorder %v40_v0, 0  ;;  %vm44_vm5 = vcmp.lt.s32.totalorder %v40_v0, 128  ;;  %s62_s1 = sshll.u32 %s160_s0, 4  ;;  %s64_s21 = sshll.u32 %s187_s2, 4  ;;  %s63_s1 = int_to_ptr.vmem [resolvable:$true] %s62_s1  ;;  %s65_s21 = int_to_ptr.hbm [resolvable:$true] %s64_s21 }
   0xd   :  { %v47_v1 = vsel %vm46_vm0, %v40_v0, 0  ;;  %vm43_vm4 = vmand %vm41_vm2, %vm42_vm3 }
   0xe   :  { %vm48_vm1 = vcmp.lt.s32.totalorder %v47_v1, 127  ;;  %vm45_vm6 = vmand %vm43_vm4, %vm44_vm5 }
   0xf   :  { %v49_v2 = vsel %vm48_vm1, %v47_v1, 127 }
  0x10   :  { %78 = vset.pattern.permute.xlu0 %v49_v2 }
  0x18   :  { %53 = vperm.xlu0 %78, %v79_v3  }
  0x8a   :  { %v54_v4 = vpop.permute.xlu0 %53 }
  0x8b   :  { %v55_v5 = vsel %vm45_vm6, %v54_v4, 4294967295 }
  0x8c   :  { %56 = vst [vmem:[#allocation7] sm:$0xff] %v55_v5 }
  0x8d   :  { %67 = dma.vmem_to_hbm [thread:$0]  %s63_s1, 128, %s65_s21, [#allocation4]  }
  0x8e   :  { %156 = dma.done.wait [#allocation4], 128  }
  0x8f   :  { %157 = vsyncadd [#allocation4], 4294967168 }
  0x90   :  { %72 = vsyncpa [#allocation3], 1 }
  0x91   :  { %73 = vsyncpa [#allocation6], 1 }
  0x92   :  { %74 = vsyncpa [#allocation4], 1 }

</bundles_post_ra>
